<compile_context>
chip_gen: v7x
topology: tpu7x:2x2x1
jax: 0.10.0
libtpu: 0.0.40
codegen_flags: <defaults>
</compile_context>

<pallas_src>
import functools

import jax
import jax.numpy as jnp
from jax.experimental import pallas as pl
from jax.experimental.pallas import tpu as pltpu

EPS = 1e-5  # nn.InstanceNorm2d default eps (affine=False, no running stats)


def _flat_halo(width):
    # Halo must cover the largest flat shift |dy*W + dx| = W + 1; round up to a
    # lane multiple so the interior copy lands on an aligned lane offset.
    return ((width + 1 + 127) // 128) * 128


def residual_block_kernel(x_ref, w_ref, o_ref, pbuf, imcol, acc, *, W):
    """One batch element per grid step (channels-first, spatial flattened).

    x_ref : [1, C, S]          input image, S = H*W (spatial on the lane axis)
    w_ref : [3, C, 3*C]        weights, laid out [kh, c_out, kw*C + c_in]
    o_ref : [1, C, S]          output
    pbuf  : VMEM [C, S+2*PAD]  flat zero-halo buffer (in-kernel pad=1)
    imcol : VMEM [3, C, S]     per-row im2col (3 width-taps stacked on K)
    acc   : VMEM [C, S] f32    conv accumulator
    """
    C, S = x_ref.shape[1], x_ref.shape[2]
    PAD = _flat_halo(W)

    # ---- build the zero-padded flat image in VMEM (replaces wrapper jnp.pad) ----
    x = x_ref[0]                                                       # [C, S]
    pbuf[:, 0:PAD] = jnp.zeros((C, PAD), pbuf.dtype)                   # left halo
    pbuf[:, PAD + S:PAD + S + PAD] = jnp.zeros((C, PAD), pbuf.dtype)   # right halo
    pbuf[:, PAD:PAD + S] = x                                           # interior (aligned)

    # Column-validity masks for the dx = -1 / +1 taps (kill cross-row bleed).
    col = jax.lax.broadcasted_iota(jnp.int32, (1, S), 1) % W
    mask_l = col != 0          # output column has a left  neighbour in its row
    mask_r = col != (W - 1)    # output column has a right neighbour in its row

    # ---- 3x3 conv as 3 matmuls (K = 3*C), one per kernel row ----
    for kh in range(3):
        dy = kh - 1
        for kw_i in range(3):
            dx = kw_i - 1
            shift = dy * W + dx
            r = pbuf[:, PAD + shift:PAD + shift + S]                   # lane-window read
            if dx == -1:
                r = jnp.where(mask_l, r, jnp.zeros_like(r))
            elif dx == 1:
                r = jnp.where(mask_r, r, jnp.zeros_like(r))
            imcol[kw_i] = r
        contrib = jnp.dot(w_ref[kh], imcol[...].reshape(3 * C, S),
                          preferred_element_type=jnp.float32)          # [C, S]
        if kh == 0:
            acc[...] = contrib
        else:
            acc[...] = acc[...] + contrib

    # ---- InstanceNorm2d (one-pass stats, f32) + ReLU + residual ----
    a = acc[...]
    inv_n = 1.0 / float(S)
    mean = jnp.sum(a, axis=1, keepdims=True) * inv_n                   # [C, 1]
    mean_sq = jnp.sum(a * a, axis=1, keepdims=True) * inv_n            # [C, 1]
    var = mean_sq - mean * mean                                        # biased variance
    y = (a - mean) * jax.lax.rsqrt(var + EPS)
    y = jnp.maximum(y, 0.0) + x.astype(jnp.float32)
    o_ref[...] = y.reshape(1, C, S).astype(o_ref.dtype)


def residual_block(x_nchw, w_oihw):
    """x_nchw: [B, C, H, W] float32; w_oihw: [C, C, 3, 3] (PyTorch OIHW layout)."""
    B, C, H, W = x_nchw.shape
    S = H * W
    PAD = _flat_halo(W)

    # Free reshape (no transpose, no pad): channels-first, spatial flattened.
    x = x_nchw.reshape(B, C, S)
    # [kh, c_out, kw*C + c_in] so each kernel row is one [C, 3C] matmul LHS.
    w_t = jnp.transpose(w_oihw, (2, 0, 3, 1)).reshape(3, C, 3 * C)

    kernel = functools.partial(residual_block_kernel, W=W)

    out = pl.pallas_call(
        kernel,
        out_shape=jax.ShapeDtypeStruct((B, C, S), x.dtype),
        grid_spec=pltpu.PrefetchScalarGridSpec(
            num_scalar_prefetch=0,
            grid=(B,),
            in_specs=[
                pl.BlockSpec((1, C, S), lambda b: (b, 0, 0)),
                pl.BlockSpec((3, C, 3 * C), lambda b: (0, 0, 0)),
            ],
            out_specs=pl.BlockSpec((1, C, S), lambda b: (b, 0, 0)),
            scratch_shapes=[
                pltpu.VMEM((C, S + 2 * PAD), x.dtype),   # flat padded image
                pltpu.VMEM((3, C, S), x.dtype),          # per-row im2col
                pltpu.VMEM((C, S), jnp.float32),         # conv accumulator
            ],
        ),
        compiler_params=pltpu.CompilerParams(
            dimension_semantics=("parallel",),
        ),
    )(x, w_t)

    # TODO(synk): for generator-scale shapes (C=256, 64x64+ spatial) add an
    # H-row-tile grid axis with two-pass InstanceNorm partial sums so the
    # working set stays inside v7x's 64 MiB VMEM.
    return out.reshape(B, C, H, W)


def reference(x_nchw, w_oihw):
    """Pure-JAX reference matching the PyTorch module semantics."""
    conv = jax.lax.conv_general_dilated(
        x_nchw, w_oihw, window_strides=(1, 1), padding=((1, 1), (1, 1)),
        dimension_numbers=("NCHW", "OIHW", "NCHW"),
    )
    mean = jnp.mean(conv, axis=(2, 3), keepdims=True)
    var = jnp.mean((conv - mean) ** 2, axis=(2, 3), keepdims=True)
    y = (conv - mean) * jax.lax.rsqrt(var + EPS)
    return jnp.maximum(y, 0.0) + x_nchw


if __name__ == "__main__":
    B, C, H, W = 2, 4, 16, 16

    key = jax.random.PRNGKey(0)
    kx, kw = jax.random.split(key)

    x = jax.random.normal(kx, (B, C, H, W), dtype=jnp.float32)
    fan_in = C * 3 * 3
    w = jax.random.uniform(
        kw, (C, C, 3, 3), dtype=jnp.float32,
        minval=-1.0, maxval=1.0,
    ) * (1.0 / jnp.sqrt(fan_in))

    out = jax.block_until_ready(residual_block(x, w))
    ref = jax.block_until_ready(reference(x, w))

    assert out.shape == (B, C, H, W)
    assert jnp.allclose(out, ref, atol=1e-2, rtol=1e-2), "mismatch vs reference"

    print("KERNEL_OK")
</pallas_src>

<mosaic_0001>
module attributes {stable_mosaic.version = 11 : i64} {
  func.func @residual_block_kernel(%arg0: i32, %arg1: memref<1x4x256xf32, #tpu.memory_space<vmem>>, %arg2: memref<3x4x12xf32, #tpu.memory_space<vmem>>, %arg3: memref<1x4x256xf32, #tpu.memory_space<vmem>>, %arg4: memref<4x512xf32, #tpu.memory_space<vmem>>, %arg5: memref<3x4x256xf32, #tpu.memory_space<vmem>>, %arg6: memref<4x256xf32, #tpu.memory_space<vmem>>) attributes {dimension_semantics = [#tpu.dimension_semantics<parallel>], iteration_bounds = array<i64: 2>, scalar_prefetch = 0 : i64, scratch_operands = 3 : i64, tpu.core_type = #tpu.core_type<tc>, window_params = [{transform_indices = @transform_0, window_bounds = array<i64: 1, 4, 256>}, {pipeline_mode = #tpu.pipeline_mode<synchronous>, transform_indices = @transform_1, window_bounds = array<i64: 3, 4, 12>}, {transform_indices = @transform_2, window_bounds = array<i64: 1, 4, 256>}]} {
    %c0 = arith.constant 0 : index
    %c0_0 = arith.constant 0 : index
    %c0_1 = arith.constant 0 : index
    %0 = vector.load %arg1[%c0, %c0_0, %c0_1] : memref<1x4x256xf32, #tpu.memory_space<vmem>>, vector<1x4x256xf32>
    %1 = vector.shape_cast %0 : vector<1x4x256xf32> to vector<4x256xf32>
    %cst = arith.constant 0.000000e+00 : f32
    %2 = vector.broadcast %cst : f32 to vector<4x128xf32>
    %c0_2 = arith.constant 0 : index
    %c0_3 = arith.constant 0 : index
    %3 = vector.load %arg4[%c0_2, %c0_3] : memref<4x512xf32, #tpu.memory_space<vmem>>, vector<4x128xf32>
    tpu.vector_store %arg4[%c0_2, %c0_3], %2 {strides = array<i32>} : memref<4x512xf32, #tpu.memory_space<vmem>>, vector<4x128xf32>,
    %cst_4 = arith.constant 0.000000e+00 : f32
    %4 = vector.broadcast %cst_4 : f32 to vector<4x128xf32>
    %c0_5 = arith.constant 0 : index
    %c384 = arith.constant 384 : index
    %5 = vector.load %arg4[%c0_5, %c384] : memref<4x512xf32, #tpu.memory_space<vmem>>, vector<4x128xf32>
    tpu.vector_store %arg4[%c0_5, %c384], %4 {strides = array<i32>} : memref<4x512xf32, #tpu.memory_space<vmem>>, vector<4x128xf32>,
    %c0_6 = arith.constant 0 : index
    %c128 = arith.constant 128 : index
    %6 = vector.load %arg4[%c0_6, %c128] : memref<4x512xf32, #tpu.memory_space<vmem>>, vector<4x256xf32>
    tpu.vector_store %arg4[%c0_6, %c128], %1 {strides = array<i32>} : memref<4x512xf32, #tpu.memory_space<vmem>>, vector<4x256xf32>,
    %7 = tpu.iota {dimensions = array<i32: 1>} : vector<1x256xi32>
    %c16_i32 = arith.constant 16 : i32
    %c0_i32 = arith.constant 0 : i32
    %8 = arith.cmpi eq, %c16_i32, %c0_i32 : i32
    %c1_i32 = arith.constant 1 : i32
    %9 = arith.select %8, %c1_i32, %c16_i32 : i32
    %10 = vector.broadcast %9 : i32 to vector<1x256xi32>
    %11 = arith.remsi %7, %10 : vector<1x256xi32>
    %c0_i32_7 = arith.constant 0 : i32
    %12 = vector.broadcast %c0_i32_7 : i32 to vector<1x256xi32>
    %13 = arith.cmpi ne, %11, %12 : vector<1x256xi32>
    %c0_i32_8 = arith.constant 0 : i32
    %14 = vector.broadcast %c0_i32_8 : i32 to vector<1x256xi32>
    %15 = arith.cmpi slt, %11, %14 : vector<1x256xi32>
    %c0_i32_9 = arith.constant 0 : i32
    %16 = arith.cmpi slt, %9, %c0_i32_9 : i32
    %17 = vector.broadcast %16 : i1 to vector<1x256xi1>
    %18 = vector.broadcast %17 : vector<1x256xi1> to vector<1x256xi1>
    %19 = arith.xori %15, %18 : vector<1x256xi1>
    %20 = arith.andi %19, %13 : vector<1x256xi1>
    %21 = vector.broadcast %9 : i32 to vector<1x256xi32>
    %22 = arith.addi %11, %21 : vector<1x256xi32>
    %23 = arith.select %20, %22, %11 : vector<1x256xi1>, vector<1x256xi32>
    %c0_i32_10 = arith.constant 0 : i32
    %24 = vector.broadcast %c0_i32_10 : i32 to vector<1x256xi32>
    %25 = arith.cmpi ne, %23, %24 : vector<1x256xi32>
    %c15_i32 = arith.constant 15 : i32
    %26 = vector.broadcast %c15_i32 : i32 to vector<1x256xi32>
    %27 = arith.cmpi ne, %23, %26 : vector<1x256xi32>
    %c0_11 = arith.constant 0 : index
    %c111 = arith.constant 111 : index
    %28 = vector.load %arg4[%c0_11, %c111] : memref<4x512xf32, #tpu.memory_space<vmem>>, vector<4x256xf32>
    %cst_12 = arith.constant 0.000000e+00 : f32
    %29 = vector.broadcast %cst_12 : f32 to vector<4x256xf32>
    %30 = vector.shape_cast %25 : vector<1x256xi1> to vector<1x256xi1>
    %31 = vector.broadcast %30 : vector<1x256xi1> to vector<4x256xi1>
    %32 = arith.select %31, %28, %29 : vector<4x256xi1>, vector<4x256xf32>
    %c0_13 = arith.constant 0 : index
    %c0_14 = arith.constant 0 : index
    %c0_15 = arith.constant 0 : index
    %33 = vector.load %arg5[%c0_13, %c0_14, %c0_15] : memref<3x4x256xf32, #tpu.memory_space<vmem>>, vector<1x4x256xf32>
    %34 = vector.shape_cast %33 : vector<1x4x256xf32> to vector<4x256xf32>
    %35 = vector.shape_cast %32 : vector<4x256xf32> to vector<1x4x256xf32>
    tpu.vector_store %arg5[%c0_13, %c0_14, %c0_15], %35 {strides = array<i32>} : memref<3x4x256xf32, #tpu.memory_space<vmem>>, vector<1x4x256xf32>,
    %c0_16 = arith.constant 0 : index
    %c112 = arith.constant 112 : index
    %36 = vector.load %arg4[%c0_16, %c112] : memref<4x512xf32, #tpu.memory_space<vmem>>, vector<4x256xf32>
    %c1 = arith.constant 1 : index
    %c0_17 = arith.constant 0 : index
    %c0_18 = arith.constant 0 : index
    %37 = vector.load %arg5[%c1, %c0_17, %c0_18] : memref<3x4x256xf32, #tpu.memory_space<vmem>>, vector<1x4x256xf32>
    %38 = vector.shape_cast %37 : vector<1x4x256xf32> to vector<4x256xf32>
    %39 = vector.shape_cast %36 : vector<4x256xf32> to vector<1x4x256xf32>
    tpu.vector_store %arg5[%c1, %c0_17, %c0_18], %39 {strides = array<i32>} : memref<3x4x256xf32, #tpu.memory_space<vmem>>, vector<1x4x256xf32>,
    %c0_19 = arith.constant 0 : index
    %c113 = arith.constant 113 : index
    %40 = vector.load %arg4[%c0_19, %c113] : memref<4x512xf32, #tpu.memory_space<vmem>>, vector<4x256xf32>
    %cst_20 = arith.constant 0.000000e+00 : f32
    %41 = vector.broadcast %cst_20 : f32 to vector<4x256xf32>
    %42 = vector.shape_cast %27 : vector<1x256xi1> to vector<1x256xi1>
    %43 = vector.broadcast %42 : vector<1x256xi1> to vector<4x256xi1>
    %44 = arith.select %43, %40, %41 : vector<4x256xi1>, vector<4x256xf32>
    %c2 = arith.constant 2 : index
    %c0_21 = arith.constant 0 : index
    %c0_22 = arith.constant 0 : index
    %45 = vector.load %arg5[%c2, %c0_21, %c0_22] : memref<3x4x256xf32, #tpu.memory_space<vmem>>, vector<1x4x256xf32>
    %46 = vector.shape_cast %45 : vector<1x4x256xf32> to vector<4x256xf32>
    %47 = vector.shape_cast %44 : vector<4x256xf32> to vector<1x4x256xf32>
    tpu.vector_store %arg5[%c2, %c0_21, %c0_22], %47 {strides = array<i32>} : memref<3x4x256xf32, #tpu.memory_space<vmem>>, vector<1x4x256xf32>,
    %c0_23 = arith.constant 0 : index
    %c0_24 = arith.constant 0 : index
    %c0_25 = arith.constant 0 : index
    %48 = vector.load %arg2[%c0_23, %c0_24, %c0_25] : memref<3x4x12xf32, #tpu.memory_space<vmem>>, vector<1x4x12xf32>
    %49 = vector.shape_cast %48 : vector<1x4x12xf32> to vector<4x12xf32>
    %c0_26 = arith.constant 0 : index
    %c0_27 = arith.constant 0 : index
    %c0_28 = arith.constant 0 : index
    %50 = vector.load %arg5[%c0_26, %c0_27, %c0_28] : memref<3x4x256xf32, #tpu.memory_space<vmem>>, vector<3x4x256xf32>
    %51 = vector.shape_cast %50 : vector<3x4x256xf32> to vector<12x256xf32>
    %cst_29 = arith.constant dense<0.000000e+00> : vector<4x256xf32>
    %52 = tpu.matmul %49, %51, %cst_29 {dimension_numbers = #tpu.dot_dimension_numbers<[1], [0], [0], [1], [0, 0, 1, 1], [], []>} : vector<4x12xf32>, vector<12x256xf32>, vector<4x256xf32> -> vector<4x256xf32>
    %c0_30 = arith.constant 0 : index
    %c0_31 = arith.constant 0 : index
    %53 = vector.load %arg6[%c0_30, %c0_31] : memref<4x256xf32, #tpu.memory_space<vmem>>, vector<4x256xf32>
    tpu.vector_store %arg6[%c0_30, %c0_31], %52 {strides = array<i32>} : memref<4x256xf32, #tpu.memory_space<vmem>>, vector<4x256xf32>,
    %c0_32 = arith.constant 0 : index
    %c127 = arith.constant 127 : index
    %54 = vector.load %arg4[%c0_32, %c127] : memref<4x512xf32, #tpu.memory_space<vmem>>, vector<4x256xf32>
    %cst_33 = arith.constant 0.000000e+00 : f32
    %55 = vector.broadcast %cst_33 : f32 to vector<4x256xf32>
    %56 = vector.shape_cast %25 : vector<1x256xi1> to vector<1x256xi1>
    %57 = vector.broadcast %56 : vector<1x256xi1> to vector<4x256xi1>
    %58 = arith.select %57, %54, %55 : vector<4x256xi1>, vector<4x256xf32>
    %c0_34 = arith.constant 0 : index
    %c0_35 = arith.constant 0 : index
    %c0_36 = arith.constant 0 : index
    %59 = vector.load %arg5[%c0_34, %c0_35, %c0_36] : memref<3x4x256xf32, #tpu.memory_space<vmem>>, vector<1x4x256xf32>
    %60 = vector.shape_cast %59 : vector<1x4x256xf32> to vector<4x256xf32>
    %61 = vector.shape_cast %58 : vector<4x256xf32> to vector<1x4x256xf32>
    tpu.vector_store %arg5[%c0_34, %c0_35, %c0_36], %61 {strides = array<i32>} : memref<3x4x256xf32, #tpu.memory_space<vmem>>, vector<1x4x256xf32>,
    %c0_37 = arith.constant 0 : index
    %c128_38 = arith.constant 128 : index
    %62 = vector.load %arg4[%c0_37, %c128_38] : memref<4x512xf32, #tpu.memory_space<vmem>>, vector<4x256xf32>
    %c1_39 = arith.constant 1 : index
    %c0_40 = arith.constant 0 : index
    %c0_41 = arith.constant 0 : index
    %63 = vector.load %arg5[%c1_39, %c0_40, %c0_41] : memref<3x4x256xf32, #tpu.memory_space<vmem>>, vector<1x4x256xf32>
    %64 = vector.shape_cast %63 : vector<1x4x256xf32> to vector<4x256xf32>
    %65 = vector.shape_cast %62 : vector<4x256xf32> to vector<1x4x256xf32>
    tpu.vector_store %arg5[%c1_39, %c0_40, %c0_41], %65 {strides = array<i32>} : memref<3x4x256xf32, #tpu.memory_space<vmem>>, vector<1x4x256xf32>,
    %c0_42 = arith.constant 0 : index
    %c129 = arith.constant 129 : index
    %66 = vector.load %arg4[%c0_42, %c129] : memref<4x512xf32, #tpu.memory_space<vmem>>, vector<4x256xf32>
    %cst_43 = arith.constant 0.000000e+00 : f32
    %67 = vector.broadcast %cst_43 : f32 to vector<4x256xf32>
    %68 = vector.shape_cast %27 : vector<1x256xi1> to vector<1x256xi1>
    %69 = vector.broadcast %68 : vector<1x256xi1> to vector<4x256xi1>
    %70 = arith.select %69, %66, %67 : vector<4x256xi1>, vector<4x256xf32>
    %c2_44 = arith.constant 2 : index
    %c0_45 = arith.constant 0 : index
    %c0_46 = arith.constant 0 : index
    %71 = vector.load %arg5[%c2_44, %c0_45, %c0_46] : memref<3x4x256xf32, #tpu.memory_space<vmem>>, vector<1x4x256xf32>
    %72 = vector.shape_cast %71 : vector<1x4x256xf32> to vector<4x256xf32>
    %73 = vector.shape_cast %70 : vector<4x256xf32> to vector<1x4x256xf32>
    tpu.vector_store %arg5[%c2_44, %c0_45, %c0_46], %73 {strides = array<i32>} : memref<3x4x256xf32, #tpu.memory_space<vmem>>, vector<1x4x256xf32>,
    %c1_47 = arith.constant 1 : index
    %c0_48 = arith.constant 0 : index
    %c0_49 = arith.constant 0 : index
    %74 = vector.load %arg2[%c1_47, %c0_48, %c0_49] : memref<3x4x12xf32, #tpu.memory_space<vmem>>, vector<1x4x12xf32>
    %75 = vector.shape_cast %74 : vector<1x4x12xf32> to vector<4x12xf32>
    %c0_50 = arith.constant 0 : index
    %c0_51 = arith.constant 0 : index
    %c0_52 = arith.constant 0 : index
    %76 = vector.load %arg5[%c0_50, %c0_51, %c0_52] : memref<3x4x256xf32, #tpu.memory_space<vmem>>, vector<3x4x256xf32>
    %77 = vector.shape_cast %76 : vector<3x4x256xf32> to vector<12x256xf32>
    %cst_53 = arith.constant dense<0.000000e+00> : vector<4x256xf32>
    %78 = tpu.matmul %75, %77, %cst_53 {dimension_numbers = #tpu.dot_dimension_numbers<[1], [0], [0], [1], [0, 0, 1, 1], [], []>} : vector<4x12xf32>, vector<12x256xf32>, vector<4x256xf32> -> vector<4x256xf32>
    %c0_54 = arith.constant 0 : index
    %c0_55 = arith.constant 0 : index
    %79 = vector.load %arg6[%c0_54, %c0_55] : memref<4x256xf32, #tpu.memory_space<vmem>>, vector<4x256xf32>
    %80 = arith.addf %79, %78 : vector<4x256xf32>
    %c0_56 = arith.constant 0 : index
    %c0_57 = arith.constant 0 : index
    %81 = vector.load %arg6[%c0_56, %c0_57] : memref<4x256xf32, #tpu.memory_space<vmem>>, vector<4x256xf32>
    tpu.vector_store %arg6[%c0_56, %c0_57], %80 {strides = array<i32>} : memref<4x256xf32, #tpu.memory_space<vmem>>, vector<4x256xf32>,
    %c0_58 = arith.constant 0 : index
    %c143 = arith.constant 143 : index
    %82 = vector.load %arg4[%c0_58, %c143] : memref<4x512xf32, #tpu.memory_space<vmem>>, vector<4x256xf32>
    %cst_59 = arith.constant 0.000000e+00 : f32
    %83 = vector.broadcast %cst_59 : f32 to vector<4x256xf32>
    %84 = vector.shape_cast %25 : vector<1x256xi1> to vector<1x256xi1>
    %85 = vector.broadcast %84 : vector<1x256xi1> to vector<4x256xi1>
    %86 = arith.select %85, %82, %83 : vector<4x256xi1>, vector<4x256xf32>
    %c0_60 = arith.constant 0 : index
    %c0_61 = arith.constant 0 : index
    %c0_62 = arith.constant 0 : index
    %87 = vector.load %arg5[%c0_60, %c0_61, %c0_62] : memref<3x4x256xf32, #tpu.memory_space<vmem>>, vector<1x4x256xf32>
    %88 = vector.shape_cast %87 : vector<1x4x256xf32> to vector<4x256xf32>
    %89 = vector.shape_cast %86 : vector<4x256xf32> to vector<1x4x256xf32>
    tpu.vector_store %arg5[%c0_60, %c0_61, %c0_62], %89 {strides = array<i32>} : memref<3x4x256xf32, #tpu.memory_space<vmem>>, vector<1x4x256xf32>,
    %c0_63 = arith.constant 0 : index
    %c144 = arith.constant 144 : index
    %90 = vector.load %arg4[%c0_63, %c144] : memref<4x512xf32, #tpu.memory_space<vmem>>, vector<4x256xf32>
    %c1_64 = arith.constant 1 : index
    %c0_65 = arith.constant 0 : index
    %c0_66 = arith.constant 0 : index
    %91 = vector.load %arg5[%c1_64, %c0_65, %c0_66] : memref<3x4x256xf32, #tpu.memory_space<vmem>>, vector<1x4x256xf32>
    %92 = vector.shape_cast %91 : vector<1x4x256xf32> to vector<4x256xf32>
    %93 = vector.shape_cast %90 : vector<4x256xf32> to vector<1x4x256xf32>
    tpu.vector_store %arg5[%c1_64, %c0_65, %c0_66], %93 {strides = array<i32>} : memref<3x4x256xf32, #tpu.memory_space<vmem>>, vector<1x4x256xf32>,
    %c0_67 = arith.constant 0 : index
    %c145 = arith.constant 145 : index
    %94 = vector.load %arg4[%c0_67, %c145] : memref<4x512xf32, #tpu.memory_space<vmem>>, vector<4x256xf32>
    %cst_68 = arith.constant 0.000000e+00 : f32
    %95 = vector.broadcast %cst_68 : f32 to vector<4x256xf32>
    %96 = vector.shape_cast %27 : vector<1x256xi1> to vector<1x256xi1>
    %97 = vector.broadcast %96 : vector<1x256xi1> to vector<4x256xi1>
    %98 = arith.select %97, %94, %95 : vector<4x256xi1>, vector<4x256xf32>
    %c2_69 = arith.constant 2 : index
    %c0_70 = arith.constant 0 : index
    %c0_71 = arith.constant 0 : index
    %99 = vector.load %arg5[%c2_69, %c0_70, %c0_71] : memref<3x4x256xf32, #tpu.memory_space<vmem>>, vector<1x4x256xf32>
    %100 = vector.shape_cast %99 : vector<1x4x256xf32> to vector<4x256xf32>
    %101 = vector.shape_cast %98 : vector<4x256xf32> to vector<1x4x256xf32>
    tpu.vector_store %arg5[%c2_69, %c0_70, %c0_71], %101 {strides = array<i32>} : memref<3x4x256xf32, #tpu.memory_space<vmem>>, vector<1x4x256xf32>,
    %c2_72 = arith.constant 2 : index
    %c0_73 = arith.constant 0 : index
    %c0_74 = arith.constant 0 : index
    %102 = vector.load %arg2[%c2_72, %c0_73, %c0_74] : memref<3x4x12xf32, #tpu.memory_space<vmem>>, vector<1x4x12xf32>
    %103 = vector.shape_cast %102 : vector<1x4x12xf32> to vector<4x12xf32>
    %c0_75 = arith.constant 0 : index
    %c0_76 = arith.constant 0 : index
    %c0_77 = arith.constant 0 : index
    %104 = vector.load %arg5[%c0_75, %c0_76, %c0_77] : memref<3x4x256xf32, #tpu.memory_space<vmem>>, vector<3x4x256xf32>
    %105 = vector.shape_cast %104 : vector<3x4x256xf32> to vector<12x256xf32>
    %cst_78 = arith.constant dense<0.000000e+00> : vector<4x256xf32>
    %106 = tpu.matmul %103, %105, %cst_78 {dimension_numbers = #tpu.dot_dimension_numbers<[1], [0], [0], [1], [0, 0, 1, 1], [], []>} : vector<4x12xf32>, vector<12x256xf32>, vector<4x256xf32> -> vector<4x256xf32>
    %c0_79 = arith.constant 0 : index
    %c0_80 = arith.constant 0 : index
    %107 = vector.load %arg6[%c0_79, %c0_80] : memref<4x256xf32, #tpu.memory_space<vmem>>, vector<4x256xf32>
    %108 = arith.addf %107, %106 : vector<4x256xf32>
    %c0_81 = arith.constant 0 : index
    %c0_82 = arith.constant 0 : index
    %109 = vector.load %arg6[%c0_81, %c0_82] : memref<4x256xf32, #tpu.memory_space<vmem>>, vector<4x256xf32>
    tpu.vector_store %arg6[%c0_81, %c0_82], %108 {strides = array<i32>} : memref<4x256xf32, #tpu.memory_space<vmem>>, vector<4x256xf32>,
    %c0_83 = arith.constant 0 : index
    %c0_84 = arith.constant 0 : index
    %110 = vector.load %arg6[%c0_83, %c0_84] : memref<4x256xf32, #tpu.memory_space<vmem>>, vector<4x256xf32>
    %cst_85 = arith.constant dense<0.000000e+00> : vector<4xf32>
    %111 = vector.multi_reduction <add>, %110, %cst_85 [1] : vector<4x256xf32> to vector<4xf32>
    %112 = vector.shape_cast %111 : vector<4xf32> to vector<4x1xf32>
    %cst_86 = arith.constant 3.906250e-03 : f32
    %113 = vector.broadcast %cst_86 : f32 to vector<4x1xf32>
    %114 = arith.mulf %112, %113 : vector<4x1xf32>
    %115 = arith.mulf %110, %110 : vector<4x256xf32>
    %cst_87 = arith.constant dense<0.000000e+00> : vector<4xf32>
    %116 = vector.multi_reduction <add>, %115, %cst_87 [1] : vector<4x256xf32> to vector<4xf32>
    %117 = vector.shape_cast %116 : vector<4xf32> to vector<4x1xf32>
    %cst_88 = arith.constant 3.906250e-03 : f32
    %118 = vector.broadcast %cst_88 : f32 to vector<4x1xf32>
    %119 = arith.mulf %117, %118 : vector<4x1xf32>
    %120 = arith.mulf %114, %114 : vector<4x1xf32>
    %121 = arith.subf %119, %120 : vector<4x1xf32>
    %122 = vector.broadcast %114 : vector<4x1xf32> to vector<4x256xf32>
    %123 = arith.subf %110, %122 : vector<4x256xf32>
    %cst_89 = arith.constant 9.99999974E-6 : f32
    %124 = vector.broadcast %cst_89 : f32 to vector<4x1xf32>
    %125 = arith.addf %121, %124 : vector<4x1xf32>
    %126 = math.rsqrt %125 : vector<4x1xf32>
    %127 = vector.broadcast %126 : vector<4x1xf32> to vector<4x256xf32>
    %128 = arith.mulf %123, %127 : vector<4x256xf32>
    %cst_90 = arith.constant 0.000000e+00 : f32
    %129 = vector.broadcast %cst_90 : f32 to vector<4x256xf32>
    %130 = arith.maximumf %128, %129 : vector<4x256xf32>
    %131 = arith.addf %130, %1 : vector<4x256xf32>
    %132 = vector.shape_cast %131 : vector<4x256xf32> to vector<1x4x256xf32>
    %c0_91 = arith.constant 0 : index
    %c0_92 = arith.constant 0 : index
    %c0_93 = arith.constant 0 : index
    %133 = vector.load %arg3[%c0_91, %c0_92, %c0_93] : memref<1x4x256xf32, #tpu.memory_space<vmem>>, vector<1x4x256xf32>
    tpu.vector_store %arg3[%c0_91, %c0_92, %c0_93], %132 {strides = array<i32>} : memref<1x4x256xf32, #tpu.memory_space<vmem>>, vector<1x4x256xf32>,
    return
  }
  func.func @transform_0(%arg0: i32) -> (i32, i32, i32) {
    %c0_i32 = arith.constant 0 : i32
    %c0_i32_0 = arith.constant 0 : i32
    %c0_i32_1 = arith.constant 0 : i32
    return %arg0, %c0_i32, %c0_i32_0 : i32, i32, i32
  }
  func.func @transform_1(%arg0: i32) -> (i32, i32, i32) {
    %c0_i32 = arith.constant 0 : i32
    %c0_i32_0 = arith.constant 0 : i32
    %c0_i32_1 = arith.constant 0 : i32
    %c0_i32_2 = arith.constant 0 : i32
    return %c0_i32, %c0_i32_0, %c0_i32_1 : i32, i32, i32
  }
  func.func @transform_2(%arg0: i32) -> (i32, i32, i32) {
    %c0_i32 = arith.constant 0 : i32
    %c0_i32_0 = arith.constant 0 : i32
    %c0_i32_1 = arith.constant 0 : i32
    return %arg0, %c0_i32, %c0_i32_0 : i32, i32, i32
  }
}

</mosaic_0001>

<bundles_post_ra>
// kernel: tpu_custom_call.1
= control target key start
LH: loop header
LB: loop body
LE: loop exit
PB: predicated region body
PF: predicated region fallthrough
CT: control target
= control target key end

     0   :  { %7 = vsyncpa [#allocation6], 0  ;;  %s1400_s0 = inlined_call_operand.hbm [shape: f32[2,4,256], index: 0, kind: input, shape index: {}]   ;;  %s1401_s1 = inlined_call_operand.hbm [shape: f32[3,4,12], index: 1, kind: input, shape index: {}]   ;;  %s1402_s2 = inlined_call_operand.hbm [shape: f32[2,4,256], index: 2, kind: output, shape index: {}]  }
   0x1   :  { %9 = vsyncpa [#allocation6 + $0x1], 0 }
   0x2   :  { %10 = vsyncpa [#allocation9], 0 }
   0x3   :  { %11 = vsyncpa [#allocation7], 0 }
   0x4   :  { %13 = vsyncpa [#allocation7 + $0x1], 0  ;;  %s1111_s9 = smov 0   ;;  %s1113_s10 = smov 0  }
   0x5   :  { %s1115_s11 = smov 0   ;;  %s1117_s12 = smov 0  }
   0x6 LB: > { %s1132_s13 = sadd.s32 4294967295, %s1078_s12   ;;  %s825_s14 = sadd.s32 4294967294, %s1078_s12   ;;  %s1078_s12 = sphi %s1117_s12, %s1432_s12   ;;  %s1074_s11 = sphi %s1115_s11, %s1431_s11   ;;  %s1070_s10 = sphi %s1113_s10, %s1430_s10   ;;  %s1066_s9 = sphi %s1111_s9, %s1429_s9  }
   0x7   : > { %p39_p0 = scmp.ne.s32.totalorder %s1070_s10, %s1066_s9  ;;  %p1403_p1 = scmp.eq.s32.totalorder %s1132_s13, 0 }
   0x8   : > { %p90_p3 = scmp.eq.s32.totalorder %s825_s14, 1  ;;  %p826_p5 = scmp.ge.s32.totalorder %s1078_s12, 1 }
   0x9   : > { %p1141_p4 = por %p1403_p1, %p39_p0  ;;  %p97_p7 = scmp.lt.s32.totalorder %s1078_s12, 3 }
   0xa   : > { %p1146_p6 = por %p90_p3, %p39_p0  ;;  %s1080_s18 = smov [#allocation8]  }
   0xb   : > { %s1406_s15 = scalar_select %p1141_p4, 1, 0 }
   0xc   : > { %s1407_s16 = scalar_select %p1146_p6, 1, 0 }
   0xd   : > { %p1151_p8 = pnand %p826_p5, %p97_p7  ;;  %s109_s19 = sshll.u32 %s1080_s18, 4  ;;  %s1155_s19 = int_to_ptr.vmem [resolvable:$true] %s109_s19 }
   0xe   : > { %s1167_s21 = sadd.s32 1, %s1078_s12   ;;  %s26_s22 = sadd.s32 1, %s1074_s11 }
   0xf   : > { %s1408_s17 = scalar_select %p1151_p8, 1, 0 }
  0x10   : > { %p884_p9 = pneg %p1151_p8  ;;  %s23_s23 = ssub.s32 %s1078_s12, %s1167_s21 }
  0x11   : > { %s950_s26 = scalar_lea.hbm %s1401_s1, 192 }
  0x12   : > { %p1162_p11 = pnand %p884_p9, %p1403_p1  ;;  %p951_p12 = scmp.ne.s32.totalorder %s1401_s1, %s950_s26 }
  0x13   : > { %p957_p5 = scmp.lt.u32.totalorder %s950_s26, %s1401_s1 }
  0x14   : > { %p952_p13 = pneg %p1162_p11 }
  0x16   : > { %p953_p0 = pnand %p952_p13, %p951_p12 }
  0x18   : > { %p954_p3 = pneg %p953_p0 }
  0x1a   : > { %p959_p7 = pnand %p957_p5, %p954_p3 }
  0x1c   : > { %962 = shalt.err (!%p959_p7)
}
  0x1d   : > { %s963_s3 = scalar_lea.vmem %s1155_s19, 192  ;;  %p971_p2 = scmp.lt.s32.totalorder %s1155_s19, %s1155_s19 }
  0x1e   : > { %p964_p9 = scmp.ne.s32.totalorder %s1155_s19, %s963_s3  ;;  %p972_p6 = scmp.lt.s32.totalorder %s963_s3, %s963_s3 }
  0x20   : > { %p966_p10 = pnand %p964_p9, %p952_p13  ;;  %p973_p4 = por %p972_p6, %p971_p2 }
  0x22   : > { %p967_p1 = pneg %p966_p10 }
  0x24   : > { %p974_p8 = pnand %p973_p4, %p967_p1 }
  0x26   : > { %977 = shalt.err (!%p974_p8)
}
  0x27   : > { %s1081_s4 = smov 64   ;;  %s1082_s5 = smov 4  }
  0x28   : > { %887 = dma.hbm_to_vmem [thread:$0]  (!%p1162_p11), %s1401_s1, 192, %s1155_s19, [#allocation9], %s1081_s4, %s1081_s4, %s1082_s5  }
  0x29   : > { %p24_p2 = scmp.eq.s32.totalorder %s23_s23, 0  ;;  %p33_p1 = scmp.ne.s32.totalorder %s1074_s11, %s1070_s10 }
  0x2a   : > { %p34_p4 = scmp.eq.s32.totalorder %s1078_s12, 0  ;;  %p897_p6 = scmp.lt.s32.totalorder %s1078_s12, 2 }
  0x2b   : > { %s1198_s8 = scalar_select %p24_p2, %s1074_s11, %s26_s22  }
  0x2c   : > { %p35_p8 = por %p34_p4, %p33_p1  ;;  %p1410_p10 = scmp.eq.s32.totalorder %s1132_s13, 1 }
  0x2d   : > { %s123_s18 = sand.u32 1, %s1074_s11   ;;  %s850_s24 = sshll.u32 %s1078_s12, 7 }
  0x2e   : > { %p1202_p12 = por %p1410_p10, %p33_p1  ;;  %s829_s25 = sshll.u32 %s123_s18, 3 }
  0x2f   : > { %s1211_s27 = scalar_lea.hbm %s1400_s0, %s850_s24  ;;  %s127_s19 = scalar_lea.vmem [#allocation5], %s829_s25 }
  0x30   : > { %s135_s22 = sshll.u32 %s127_s19, 4  ;;  %p1213_p11 = pnand %p897_p6, %p35_p8  ;;  %s1217_s22 = int_to_ptr.vmem [resolvable:$true] %s135_s22 }
  0x31   : > { %s124_s28 = scalar_lea.sflag [#allocation6], %s123_s18  ;;  %s978_s29 = scalar_lea.hbm %s1211_s27, 128 }
  0x32   : > { %p979_p13 = scmp.ne.s32.totalorder %s1211_s27, %s978_s29  ;;  %p980_p0 = pneg %p1213_p11 }
  0x33   : > { %s983_s4 = scalar_lea.hbm %s1400_s0, 256  ;;  %p984_p7 = scmp.lt.u32.totalorder %s1211_s27, %s1400_s0 }
  0x34   : > { %p981_p3 = pnand %p980_p0, %p979_p13  ;;  %p985_p9 = scmp.lt.u32.totalorder %s983_s4, %s978_s29 }
  0x35   : > { %p987_p1 = scmp.lt.u32.totalorder %s978_s29, %s1211_s27 }
  0x36   : > { %p982_p5 = pneg %p981_p3  ;;  %p986_p2 = por %p985_p9, %p984_p7 }
  0x38   : > { %p988_p4 = por %p987_p1, %p986_p2 }
  0x3a   : > { %p989_p6 = pnand %p988_p4, %p982_p5 }
  0x3c   : > { %992 = shalt.err (!%p989_p6)
}
  0x3d   : > { %s993_s7 = scalar_lea.vmem %s1217_s22, 128  ;;  %s1083_s18 = smov [#allocation5]  }
  0x3e   : > { %p994_p8 = scmp.ne.s32.totalorder %s1217_s22, %s993_s7  ;;  %s998_s24 = sshll.u32 %s1083_s18, 4  ;;  %s999_s24 = int_to_ptr.vmem [resolvable:$false] %s998_s24 }
  0x3f   : > { %s1000_s25 = scalar_lea.vmem %s999_s24, 256  ;;  %p1001_p3 = scmp.lt.s32.totalorder %s1217_s22, %s999_s24 }
  0x40   : > { %p996_p10 = pnand %p994_p8, %p980_p0  ;;  %p1002_p7 = scmp.lt.s32.totalorder %s1000_s25, %s993_s7 }
  0x42   : > { %p997_p13 = pneg %p996_p10  ;;  %p1003_p9 = por %p1002_p7, %p1001_p3 }
  0x44   : > { %p1004_p2 = pnand %p1003_p9, %p997_p13 }
  0x46   : > { %1007 = shalt.err (!%p1004_p2)
}
  0x47   : > { %891 = dma.hbm_to_vmem [thread:$0]  (!%p1213_p11), %s1211_s27, 128, %s1217_s22, %s124_s28  }
  0x48   : > { %p1413_p5 = scmp.ne.s32.totalorder %s1408_s17, 0 }
  0x49   : > { %s1247_s20 = sand.u32 (!%p1413_p5), 1, %s1070_s10   ;;  %p1414_p0 = scmp.ne.s32.totalorder (!%p1413_p5), %s1406_s15, 0 }
  0x4a   : > { %144 = sbr.rel (%p1413_p5) target bundleno = 665 (0x299), region = 28  ;;  %s833_s26 = sshll.u32 (!%p1413_p5), %s1247_s20, 3 }
  0x4b   : > { %s147_s19 = scalar_lea.sflag (!%p1413_p5), [#allocation6], %s1247_s20  ;;  %s150_s29 = scalar_lea.vmem (!%p1413_p5), [#allocation5], %s833_s26 }
  0x51   : > { %1053 = dma.done.wait (%p1414_p0), %s147_s19, 128  }
  0x52   : > { %1055 = vsyncadd (%p1414_p0), %s147_s19, 4294967168  ;;  %p1415_p11 = scmp.eq.s32.totalorder %s1132_s13, 0 }
  0x54   : > { %1057 = dma.done.wait (%p1415_p11), [#allocation9], 192   ;;  %p1416_p1 = pmov %p1415_p11 }
  0x55   : > { %v1084_v0 = vmov 0.0   ;;  %v1265_v1 = vld [vmem:[%s150_s29] sm:$0xff]  ;;  %s1085_s15 = smov 17   ;;  %s1086_s17 = smov 16   ;;  %v179_v13 = vlaneseq  ;;  %vm225_vm0 = vcmask 138240   ;;  %vm247_vm3 = vcmask 1043456  }
  0x56   : > { %1059 = vsyncadd (%p1416_p1), [#allocation9], 4294967104  ;;  %176 = vst [vmem:[#allocation2] sm:$0xf] %v1084_v0  ;;  %366 = vmatprep.mubr.f32.mxu0 %v1084_v0  ;;  %510 = vmatprep.mubr.f32.mxu1 %v1084_v0  ;;  %s1087_s27 = smov 1   ;;  %s1088_s22 = smov 15   ;;  %v407_v8 = vcombine.high %v1265_v1, %v1265_v1 }
  0x57   : > { %177 = vst [vmem:[#allocation2 + $0xc] sm:$0xf] %v1084_v0  ;;  %178 = vst [vmem:[#allocation2 + $0x4] sm:$0xff] %v1265_v1  ;;  %s1089_s23 = smov 127   ;;  %s1090_s28 = smov 113   ;;  %v180_v14 = vand.u32 127, %v179_v13 }
  0x58   : > { %s1091_s30 = smov 112   ;;  %s1092_s3 = smov 111   ;;  %vm269_vm4 = vcmask 121856   ;;  %vm389_vm5 = vcmask 7168   ;;  %vm249_vm6 = vcmask 130048   ;;  %vm1093_vm9 = vmmov 1  }
  0x59   : > { %v181_v17 = vadd.s32 128, %v180_v14  ;;  %v186_v20 = vand.u32 15, %v180_v14  ;;  %vm1304_vm10 = vmpackc.low %vm247_vm3, %vm1093_vm9  ;;  %vm414_vm11 = vcmask 1039360   ;;  %vm294_vm12 = vcmask 97280   ;;  %v586_v36 = vld [vmem:[#allocation8 + $0x8] sm:$0xf] }
  0x5a   : > { %vm535_vm13 = vcmask 924672   ;;  %vm558_vm14 = vcmask 916480   ;;  %vm573_vm15 = vcmask 908288   ;;  %s851_s4 = sshll.u32 %s1132_s13, 7  ;;  %s174_s5 = scalar_lea.vmem [#allocation10], %s833_s26 }
  0x5b   : > { %v193_v21 = vand.u32 15, %v181_v17  ;;  %vm1275_vm1 = vcmp.ne.s32.totalorder %v186_v20, 0  ;;  %vm1295_vm8 = vcmp.ne.s32.totalorder %v186_v20, 15  ;;  %s745_s6 = sshll.u32 %s174_s5, 4  ;;  %s1356_s24 = scalar_lea.hbm %s1402_s2, %s851_s4  ;;  %s1358_s6 = int_to_ptr.vmem [resolvable:$true] %s745_s6 }
  0x5c   : > { %s731_s25 = scalar_lea.sflag [#allocation7], %s1247_s20  ;;  %s1008_s19 = scalar_lea.vmem %s1358_s6, 128 }
  0x5d   : > { %vm1279_vm2 = vcmp.ne.s32.totalorder %v193_v21, 0  ;;  %vm1288_vm7 = vcmp.ne.s32.totalorder %v193_v21, 15  ;;  %p1009_p4 = scmp.ne.s32.totalorder %s1358_s6, %s1008_s19  ;;  %s1095_s13 = smov [#allocation10]  }
  0x5e   : > { %v211_v2 = vld [vmem:[#allocation2 + $0x8] sm:$0xf]  ;;  %v210_v3 = vld [vmem:[#allocation2] sm:$0xff]  ;;  %v404_v9 = vld [vmem:[#allocation2 + $0xc] sm:$0xf]  ;;  %s1012_s26 = sshll.u32 %s1095_s13, 4  ;;  %s1013_s26 = int_to_ptr.vmem [resolvable:$false] %s1012_s26 }
  0x5f   : > { %223 = vrot.lane.b32.xlu1 %v211_v2, %s1085_s15  ;;  %219 = vrot.lane.b32.xlu0 %v210_v3, %s1085_s15  ;;  %v238_v4 = vld [vmem:[#allocation2 + $0x8] sm:$0xf]  ;;  %v218_v6 = vcombine.high %v210_v3, %v210_v3  ;;  %v525_v10 = vld [vmem:[#allocation2 + $0xc] sm:$0xf]  ;;  %p1010_p6 = pnand %p1009_p4, %p1202_p12  ;;  %s1014_s29 = scalar_lea.vmem %s1013_s26, 256 }
  0x60   : > { %v255_v5 = vld [vmem:[#allocation2 + $0x8] sm:$0xf]  ;;  %v548_v11 = vld [vmem:[#allocation2 + $0xc] sm:$0xf]  ;;  %p1015_p10 = scmp.lt.s32.totalorder %s1358_s6, %s1013_s26  ;;  %p1016_p13 = scmp.lt.s32.totalorder %s1014_s29, %s1008_s19 }
  0x61   : > { %v379_v7 = vld [vmem:[#allocation2 + $0x8] sm:$0xf]  ;;  %v563_v12 = vld [vmem:[#allocation2 + $0xc] sm:$0xf]  ;;  %p1011_p8 = pneg %p1010_p6 }
  0x62   : > { %p1017_p3 = por %p1016_p13, %p1015_p10 }
  0x63   : > { %241 = vrot.lane.b32.xlu1 %v210_v3, %s1086_s17  ;;  %243 = vrot.lane.b32.xlu0 %v238_v4, %s1086_s17 }
  0x64   : > { %p1018_p7 = pnand %p1017_p3, %p1011_p8 }
  0x67   : > { %383 = vrot.lane.b32.xlu1 %v210_v3, %s1087_s27  ;;  %267 = vrot.lane.b32.xlu0 %v255_v5, %s1088_s22 }
  0x6b   : > { %387 = vrot.lane.b32.xlu1 %v379_v7, %s1087_s27  ;;  %221 = vrot.lane.b32.xlu0 %v218_v6, %s1085_s15 }
  0x6f   : > { %265 = vrot.lane.b32.xlu1 %v218_v6, %s1088_s22  ;;  %385 = vrot.lane.b32.xlu0 %v218_v6, %s1087_s27 }
  0x73   : > { %410 = vrot.lane.b32.xlu1 %v407_v8, %s1089_s23  ;;  %263 = vrot.lane.b32.xlu0 %v210_v3, %s1088_s22  ;;  %v282_v3 = vld [vmem:[#allocation8] sm:$0xf] }
  0x77   : > { %529 = vrot.lane.b32.xlu1 %v1265_v1, %s1090_s28  ;;  %412 = vrot.lane.b32.xlu0 %v404_v9, %s1089_s23 }
  0x7b   : > { %533 = vrot.lane.b32.xlu1 %v525_v10, %s1090_s28  ;;  %531 = vrot.lane.b32.xlu0 %v407_v8, %s1090_s28 }
  0x7f   : > { %553 = vrot.lane.b32.xlu1 %v548_v11, %s1091_s30  ;;  %551 = vrot.lane.b32.xlu0 %v1265_v1, %s1091_s30 }
  0x83   : > { %569 = vrot.lane.b32.xlu1 %v407_v8, %s1092_s3  ;;  %408 = vrot.lane.b32.xlu0 %v1265_v1, %s1089_s23 }
  0x87   : > { %567 = vrot.lane.b32.xlu1 %v1265_v1, %s1092_s3  ;;  %571 = vrot.lane.b32.xlu0 %v563_v12, %s1092_s3 }
  0xd1   : > { %v224_v15 = vpop.permute.xlu1 %223  ;;  %v220_v16 = vpop.permute.xlu0 %219 }
  0xd5   : > { %v242_v18 = vpop.permute.xlu1 %241  ;;  %v244_v19 = vpop.permute.xlu0 %243 }
  0xd6   : > { %v245_v24 = vrot.slane %v242_v18, 4  ;;  %v246_v25 = vrot.slane %v244_v19, 4 }
  0xd8   : > { %v248_v34 = vsel %vm247_vm3, %v245_v24, %v246_v25 }
  0xd9   : > { %v384_v22 = vpop.permute.xlu1 %383  ;;  %v268_v23 = vpop.permute.xlu0 %267  ;;  %v250_v42 = vsel %vm249_vm6, %v242_v18, %v248_v34 }
  0xdd   : > { %v388_v28 = vpop.permute.xlu1 %387  ;;  %v222_v29 = vpop.permute.xlu0 %221 }
  0xde   : > { %v226_v30 = vsel %vm225_vm0, %v220_v16, %v222_v29  ;;  %v227_v31 = vsel %vm225_vm0, %v222_v29, %v224_v15 }
  0xdf   : > { %v230_v32 = vsel %vm1275_vm1, %v226_v30, 0.0  ;;  %v231_v33 = vsel %vm1279_vm2, %v227_v31, 0.0 }
  0xe0   : > { %v234_v35 = vcombine.low %v230_v32, %v231_v33  ;;  %v852_v55 = vcombine.low %v230_v32, %v250_v42 }
  0xe1   : > { %v266_v37 = vpop.permute.xlu1 %265  ;;  %v386_v38 = vpop.permute.xlu0 %385 }
  0xe2   : > { %v271_v39 = vsel %vm269_vm4, %v266_v37, %v268_v23  ;;  %v390_v40 = vsel %vm389_vm5, %v384_v22, %v386_v38  ;;  %v391_v41 = vsel %vm389_vm5, %v386_v38, %v388_v28  ;;  %v290_v45 = vcombine.high %v234_v35, %v250_v42  ;;  %v427_v35 = vld [vmem:[#allocation8 + $0x4] sm:$0xf] }
  0xe3   : > { %v275_v43 = vsel %vm1288_vm7, %v271_v39, 0.0  ;;  %v394_v47 = vsel %vm1275_vm1, %v390_v40, 0.0  ;;  %v395_v48 = vsel %vm1279_vm2, %v391_v41, 0.0 }
  0xe4   : > { %v853_v46 = vcombine.low %v275_v43, %v275_v43  ;;  %v398_v56 = vcombine.low %v394_v47, %v395_v48  ;;  %v854_v20 = vcombine.low %v394_v47, %v1265_v1 }
  0xe5   : > { %v411_v49 = vpop.permute.xlu1 %410  ;;  %v264_v50 = vpop.permute.xlu0 %263 }
  0xe6   : > { %v270_v52 = vsel %vm269_vm4, %v264_v50, %v266_v37  ;;  %v858_v53 = vpack.c.bf16 %v853_v46, %v290_v45  ;;  %v435_v63 = vcombine.high %v398_v56, %v1265_v1 }
  0xe7   : > { %v274_v54 = vsel %vm1295_vm8, %v270_v52, 0.0 }
  0xe8   : > { %v278_v57 = vcombine.low %v274_v54, %v275_v43  ;;  %860 = vmatprep.subr.msk.bf16.mxu0 %vm1304_vm10, %v858_v53 }
  0xe9   : > { %v530_v58 = vpop.permute.xlu1 %529  ;;  %v413_v59 = vpop.permute.xlu0 %412 }
  0xea   : > { %v416_v60 = vsel %vm414_vm11, %v411_v49, %v413_v59  ;;  %v861_v61 = vpack.c.bf16 %v278_v57, %v852_v55 }
  0xeb   : > { %v420_v62 = vsel %vm1288_vm7, %v416_v60, 0.0 }
  0xec   : > { %863 = vmatpush1.bf16.msk.msra.mxu0 %vm1304_vm10, %v861_v61  ;;  %v855_v2 = vcombine.low %v420_v62, %v420_v62 }
  0xed   : > { %v534_v4 = vpop.permute.xlu1 %533  ;;  %v532_v5 = vpop.permute.xlu0 %531 }
  0xee   : > { %v864_v6 = vpack.c.bf16 %v855_v2, %v435_v63  ;;  %v536_v11 = vsel %vm535_vm13, %v530_v58, %v532_v5  ;;  %v537_v12 = vsel %vm535_vm13, %v532_v5, %v534_v4  ;;  %v1094_v2 = vmov 839922192  }
  0xef   : > { %838 = vmatmul.mubr.msk.f32.vlgmr.msra.gmra.mrb[0].mxu0 %vm294_vm12, %v282_v3  ;;  %v540_v18 = vsel %vm1275_vm1, %v536_v11, 0.0  ;;  %v707_v3 = vunpack.c.l.s4 %v1094_v2 }
  0xf0   : > { %866 = vmatprep.subr.msk.bf16.mxu1 %vm1304_vm10, %v864_v6  ;;  %669 = vmatprep.mubr.f32.mxu0 %v1084_v0  ;;  %v541_v0 = vsel %vm1279_vm2, %v537_v12, 0.0 }
  0xf1   : > { %v554_v7 = vpop.permute.xlu1 %553  ;;  %v552_v8 = vpop.permute.xlu0 %551  ;;  %v544_v25 = vcombine.low %v540_v18, %v541_v0  ;;  %v708_v6 = vunpack.c.0.s8 %v707_v3 }
  0xf2   : > { %v556_v9 = vrot.slane %v554_v7, 4  ;;  %v555_v10 = vrot.slane %v552_v8, 4  ;;  %v710_v7 = vshrl.u32 %v179_v13, 7 }
  0xf4   : > { %v557_v16 = vsel %vm247_vm3, %v555_v10, %v556_v9 }
  0xf5   : > { %v570_v14 = vpop.permute.xlu1 %569  ;;  %v409_v15 = vpop.permute.xlu0 %408  ;;  %v559_v22 = vsel %vm558_vm14, %v552_v8, %v557_v16  ;;  %v711_v8 = vsub.s32 %v708_v6, %v710_v7 }
  0xf6   : > { %v415_v17 = vsel %vm414_vm11, %v409_v15, %v411_v49  ;;  %v856_v31 = vcombine.low %v540_v18, %v559_v22  ;;  %v594_v32 = vcombine.high %v544_v25, %v559_v22 }
  0xf7   : > { %v419_v19 = vsel %vm1295_vm8, %v415_v17, 0.0 }
  0xf8   : > { %v423_v21 = vcombine.low %v419_v19, %v420_v62 }
  0xf9   : > { %v568_v23 = vpop.permute.xlu1 %567  ;;  %v572_v24 = vpop.permute.xlu0 %571 }
  0xfa   : > { %v574_v28 = vsel %vm573_vm15, %v568_v23, %v570_v14  ;;  %v575_v29 = vsel %vm573_vm15, %v570_v14, %v572_v24  ;;  %v867_v30 = vpack.c.bf16 %v423_v21, %v854_v20 }
  0xfb   : > { %v578_v26 = vsel %vm1295_vm8, %v574_v28, 0.0  ;;  %v579_v27 = vsel %vm1288_vm7, %v575_v29, 0.0 }
  0xfc   : > { %v582_v33 = vcombine.low %v578_v26, %v579_v27  ;;  %v857_v34 = vcombine.low %v579_v27, %v579_v27  ;;  %869 = vmatpush1.bf16.msk.msra.mxu1 %vm1304_vm10, %v867_v30 }
  0xfe   : > { %v870_v37 = vpack.c.bf16 %v857_v34, %v594_v32  ;;  %v873_v38 = vpack.c.bf16 %v582_v33, %v856_v31 }
  0xff   : > { %841 = vmatmul.mubr.msk.f32.vlgmr.msra.gmra.mrb[0].mxu1 %vm294_vm12, %v427_v35 }
 0x100   : > { %872 = vmatprep.subr.msk.bf16.mxu0 %vm1304_vm10, %v870_v37 }
 0x101   : > { %875 = vmatpush1.bf16.msk.msra.mxu0 %vm1304_vm10, %v873_v38 }
 0x104   : > { %844 = vmatmul.mubr.msk.f32.vlgmr.msra.gmra.mrb[2].mxu0 %vm294_vm12, %v586_v36 }
 0x1c2   : > { %v368_v39 = vpop.f32.mrb[0].mxu0 }
 0x1c3   : > { %v370_v40 = vpop.f32.mrb[1].mxu0 }
 0x1c4   : > { %v375_v41 = vcombine.low %v368_v39, %v370_v40 }
 0x1d2   : > { %v512_v42 = vpop.f32.mrb[0].mxu1 }
 0x1d3   : > { %v514_v43 = vpop.f32.mrb[1].mxu1 }
 0x1d4   : > { %v520_v44 = vcombine.low %v512_v42, %v514_v43 }
 0x1d6   : > { %v522_v45 = vadd.f32 %v520_v44, %v375_v41 }
 0x1d7   : > { %v671_v46 = vpop.f32.mrb[2].mxu0 }
 0x1d8   : > { %v673_v47 = vpop.f32.mrb[3].mxu0 }
 0x1d9   : > { %v679_v48 = vcombine.low %v671_v46, %v673_v47 }
 0x1db   : > { %v681_v49 = vadd.f32 %v679_v48, %v522_v45 }
 0x1dd   : > { %v685_v50 = vcombine.high %v681_v49, %v681_v49  ;;  %v693_v52 = vmul.f32 %v681_v49, %v681_v49  ;;  %v687_v53 = vsel %vm247_vm3, %v681_v49, 0.0 }
 0x1df   : > { %v688_v51 = vsel %vm247_vm3, %v685_v50, 0.0  ;;  %v695_v54 = vcombine.high %v693_v52, %v693_v52  ;;  %v697_v56 = vsel %vm247_vm3, %v693_v52, 0.0 }
 0x1e0   : > { %v689_v55 = vadd.f32 %v688_v51, %v687_v53 }
 0x1e1   : > { %v698_v57 = vsel %vm247_vm3, %v695_v54, 0.0 }
 0x1e2   : > { %690 = vadd.xlane.f32.xlu0 %v689_v55  ;;  %v699_v58 = vadd.f32 %v698_v57, %v697_v56 }
 0x1e4   : > { %700 = vadd.xlane.f32.xlu1 %v699_v58 }
 0x26f   : > { %v691_v59 = vpop.xlane.xlu0 %690 }
 0x270   : > { %v692_v60 = vmul.f32 0.00390625, %v691_v59 }
 0x271   : > { %v701_v61 = vpop.xlane.xlu1 %700 }
 0x272   : > { %v703_v62 = vmul.f32 %v692_v60, %v692_v60  ;;  %v702_v63 = vmul.f32 0.00390625, %v701_v61  ;;  %v712_v9 = vrot.slane %v692_v60, %v711_v8 }
 0x274   : > { %v704_v4 = vsub.f32 %v702_v63, %v703_v62  ;;  %v714_v11 = vsub.f32 %v681_v49, %v712_v9 }
 0x276   : > { %v715_v5 = vadd.f32 1e-05, %v704_v4 }
 0x278   : > { %948 = vrsqrt.f32 %v715_v5 }
 0x282   : > { %v949_v10 = vpop.eup %948 }
 0x283   : > { %v724_v12 = vrot.slane %v949_v10, %v711_v8 }
 0x285   : > { %v726_v14 = vmul.f32 %v724_v12, %v714_v11 }
 0x287   : > { %v727_v15 = vmax.f32 %v726_v14, 0.0 }
 0x289   : > { %v728_v16 = vadd.f32 %v727_v15, %v1265_v1 }
 0x28b   : > { %729 = vst [vmem:[%s174_s5] sm:$0xff] %v728_v16 }
 0x28c   : > { %1021 = shalt.err (!%p1018_p7)
}
 0x28d   : > { %s1022_s20 = scalar_lea.hbm %s1356_s24, 128  ;;  %s1026_s27 = scalar_lea.hbm %s1402_s2, 256 }
 0x28e   : > { %p1023_p9 = scmp.ne.s32.totalorder %s1356_s24, %s1022_s20  ;;  %p1027_p0 = scmp.lt.u32.totalorder %s1356_s24, %s1402_s2 }
 0x28f   : > { %p1028_p11 = scmp.lt.u32.totalorder %s1026_s27, %s1022_s20  ;;  %p1030_p4 = scmp.lt.u32.totalorder %s1022_s20, %s1356_s24 }
 0x290   : > { %p1024_p2 = pnand %p1023_p9, %p1202_p12 }
 0x291   : > { %p1029_p1 = por %p1028_p11, %p1027_p0 }
 0x292   : > { %p1025_p5 = pneg %p1024_p2 }
 0x293   : > { %p1031_p6 = por %p1030_p4, %p1029_p1 }
 0x295   : > { %p1032_p8 = pnand %p1031_p6, %p1025_p5 }
 0x297   : > { %1035 = shalt.err (!%p1032_p8)
}
 0x298   : > { %882 = dma.vmem_to_hbm [thread:$0]  (%p1202_p12), %s1358_s6, 128, %s1356_s24, %s731_s25  }
 0x299 PF: > { %s757_s28 = sand.u32 1, %s1066_s9   ;;  %p1427_p10 = scmp.ne.s32.totalorder %s1407_s16, 0 }
 0x29a   : > { %p1428_p13 = scmp.ge.s32.totalorder %s1078_s12, 2  ;;  %s758_s30 = scalar_lea.sflag [#allocation7], %s757_s28 }
 0x29c   : > { %p893_p3 = pnand %p1428_p13, %p1427_p10 }
 0x29e   : > { %1061 = dma.done.wait (!%p893_p3), %s758_s30, 128  }
 0x29f   : > { %1063 = vsyncadd (!%p893_p3), %s758_s30, 4294967168  ;;  %p16_p7 = scmp.ge.s32.totalorder %s1167_s21, 4   ;;  %s1429_s9 = smov %s1070_s10 }
 0x2a0   : > { %s1430_s10 = smov %s1074_s11  ;;  %s1431_s11 = smov %s1198_s8 }
 0x2a1   : > { %s1432_s12 = smov %s1167_s21  ;;  %18 = sbr.rel (!%p16_p7) target bundleno = 6 (0x6), region = 81 }
 0x2a8   :  { %763 = vsyncpa [#allocation6], 1 }
 0x2a9   :  { %765 = vsyncpa [#allocation6 + $0x1], 1 }
 0x2aa   :  { %766 = vsyncpa [#allocation9], 1 }
 0x2ab   :  { %767 = vsyncpa [#allocation7], 1 }
 0x2ac   :  { %769 = vsyncpa [#allocation7 + $0x1], 1 }

</bundles_post_ra>
